<compile_context>
chip_gen: v6e
topology: v6e:2x2x1
jax: 0.10.0
libtpu: 0.0.40
codegen_flags: <defaults>
</compile_context>

<pallas_src>
import functools

import jax
import jax.numpy as jnp
from jax.experimental import pallas as pl
from jax.experimental.pallas import tpu as pltpu


# ----------------------------------------------------------------------------
# Kernels
# ----------------------------------------------------------------------------
def _sigmoid(y):
    # exp and approximate reciprocal both issue on the EUP slot (off the
    # VALU / MXU critical path).
    return pl.reciprocal(1.0 + jnp.exp(-y), approx=True)


def _nwl_kernel_pair(x1_ref, x2_ref,          # [TN, F_in]       (input dtype)
                     wfa_ref, wfb_ref,        # [F_in, 2H]       (bf16, fused)
                     b0_ref,                  # [1, 2H]          (f32)
                     wf_ref, bf_ref,          # [1, 2H], [1, 1]  (f32)
                     out_ref,                 # [1, TN]          (f32, lane-dense)
                     *, negative_slope):
    cd = wfa_ref.dtype
    # learner[0] on concat([e1, e2]) == x1 @ Wfa + x2 @ Wfb  (extractors fused)
    h = (jnp.dot(x1_ref[...].astype(cd), wfa_ref[...],
                 preferred_element_type=jnp.float32)
         + jnp.dot(x2_ref[...].astype(cd), wfb_ref[...],
                   preferred_element_type=jnp.float32)
         + b0_ref[...])
    h = jnp.where(h >= 0.0, h, negative_slope * h)            # leaky_relu (f32)

    # learner[-1]: Linear(2H -> 1), computed transposed so result is [1, TN]
    # (nodes on lanes -> unmasked stores, dense EUP/VPU vregs).
    y = jnp.einsum("oh,nh->on", wf_ref[...], h,
                   preferred_element_type=jnp.float32) + bf_ref[...]
    out_ref[...] = _sigmoid(y).astype(out_ref.dtype)


def _nwl_kernel_single(x1_ref, wfa_ref, b0_ref, wf_ref, bf_ref, out_ref,
                       *, negative_slope):
    # x2 is None  =>  e2 == 0 exactly  =>  drop the second matmul entirely.
    cd = wfa_ref.dtype
    h = (jnp.dot(x1_ref[...].astype(cd), wfa_ref[...],
                 preferred_element_type=jnp.float32)
         + b0_ref[...])
    h = jnp.where(h >= 0.0, h, negative_slope * h)
    y = jnp.einsum("oh,nh->on", wf_ref[...], h,
                   preferred_element_type=jnp.float32) + bf_ref[...]
    out_ref[...] = _sigmoid(y).astype(out_ref.dtype)


# ----------------------------------------------------------------------------
# Wrapper
# ----------------------------------------------------------------------------
def prepare_fused_params(params, *, compute_dtype=jnp.bfloat16):
    """Fold the (bias-free) extractors into learner[0]'s weight, once.

    params uses PyTorch nn.Linear weight shapes ([out, in]); returned dict holds
    kernel-ready, pre-transposed / fused / casted tensors.
    """
    H = params["w_ext1"].shape[0]
    L = 2 * H
    w0t = params["w_l0"].T.astype(jnp.float32)                 # [2H, 2H] (in, out)
    wfa = params["w_ext1"].T.astype(jnp.float32) @ w0t[:H, :]  # [F_in, 2H]
    wfb = params["w_ext2"].T.astype(jnp.float32) @ w0t[H:, :]  # [F_in, 2H]
    return {
        "wfa": wfa.astype(compute_dtype),
        "wfb": wfb.astype(compute_dtype),
        "b0":  params["b_l0"].reshape(1, L).astype(jnp.float32),
        "wf":  params["w_lf"].reshape(1, L).astype(jnp.float32),  # [1, 2H]
        "bf":  params["b_lf"].reshape(1, 1).astype(jnp.float32),
    }


def node_weight_learner(x1, x2, fused, *, negative_slope=0.2, block_rows=4096):
    """NodeWeightLearner forward.  x2 may be None (specialized kernel variant)."""
    N, F_in = x1.shape
    L = fused["wfa"].shape[1]

    # Row tile.  When tiling, the lane-dense output block (1, tn) needs tn % 128 == 0.
    if N <= block_rows:
        tn = N
    else:
        tn = max(128, (block_rows // 128) * 128)
    grid_n = pl.cdiv(N, tn)
    n_pad = grid_n * tn

    row_spec = pl.BlockSpec((tn, F_in), lambda i: (i, 0))
    out_spec = pl.BlockSpec((1, tn), lambda i: (0, i))
    wspec = lambda a: pl.BlockSpec(a.shape, lambda i: (0, 0))   # resident weights

    compiler_params = pltpu.CompilerParams(
        dimension_semantics=("parallel",),        # shard node tiles across TCs (v7x)
        vmem_limit_bytes=32 * 1024 * 1024,        # safe on v5e/v6e/v7x; tiles are tiny
    )
    out_shape = jax.ShapeDtypeStruct((1, n_pad), jnp.float32)

    in_bytes = jnp.dtype(x1.dtype).itemsize
    weight_bytes = sum(int(v.size) * v.dtype.itemsize for v in fused.values())

    if x2 is None:
        kernel = functools.partial(_nwl_kernel_single,
                                   negative_slope=float(negative_slope))
        cost = pl.CostEstimate(
            flops=2 * N * F_in * L + 2 * N * L,
            transcendentals=2 * N,
            bytes_accessed=N * F_in * in_bytes + N * 4 + weight_bytes,
        )
        out = pl.pallas_call(
            kernel,
            out_shape=out_shape,
            grid=(grid_n,),
            in_specs=[row_spec, wspec(fused["wfa"]), wspec(fused["b0"]),
                      wspec(fused["wf"]), wspec(fused["bf"])],
            out_specs=out_spec,
            compiler_params=compiler_params,
            cost_estimate=cost,
        )(x1, fused["wfa"], fused["b0"], fused["wf"], fused["bf"])
    else:
        kernel = functools.partial(_nwl_kernel_pair,
                                   negative_slope=float(negative_slope))
        cost = pl.CostEstimate(
            flops=4 * N * F_in * L + 2 * N * L,
            transcendentals=2 * N,
            bytes_accessed=2 * N * F_in * in_bytes + N * 4 + weight_bytes,
        )
        out = pl.pallas_call(
            kernel,
            out_shape=out_shape,
            grid=(grid_n,),
            in_specs=[row_spec, row_spec, wspec(fused["wfa"]), wspec(fused["wfb"]),
                      wspec(fused["b0"]), wspec(fused["wf"]), wspec(fused["bf"])],
            out_specs=out_spec,
            compiler_params=compiler_params,
            cost_estimate=cost,
        )(x1, x2, fused["wfa"], fused["wfb"], fused["b0"], fused["wf"], fused["bf"])

    # Free layout plumbing: (1, n_pad) row-major has the same linear order as
    # (n_pad, 1); drop the padded tail rows (garbage from the partial last tile).
    out = out.reshape(n_pad, 1)
    if n_pad != N:
        out = out[:N]
    return out


# ----------------------------------------------------------------------------
# Deterministic init (PyTorch nn.Linear conventions) + pure-JAX reference
# ----------------------------------------------------------------------------
def init_params(key, in_features, hid_features):
    L = 2 * hid_features
    ks = jax.random.split(key, 6)
    u = lambda k, shape, fan_in: jax.random.uniform(
        k, shape, jnp.float32, -1.0 / jnp.sqrt(fan_in), 1.0 / jnp.sqrt(fan_in))
    return {
        "w_ext1": u(ks[0], (hid_features, in_features), in_features),
        "w_ext2": u(ks[1], (hid_features, in_features), in_features),
        "w_l0":   u(ks[2], (L, L), L),
        "b_l0":   u(ks[3], (L,), L),
        "w_lf":   u(ks[4], (1, L), L),
        "b_lf":   u(ks[5], (1,), L),
    }


def _reference(x1, x2, params, negative_slope=0.2):
    e1 = x1 @ params["w_ext1"].T
    e2 = (jnp.zeros_like(e1) if x2 is None else x2 @ params["w_ext2"].T)
    h = jnp.concatenate([e1, e2], axis=1)
    h = h @ params["w_l0"].T + params["b_l0"]
    h = jnp.where(h >= 0, h, negative_slope * h)
    y = h @ params["w_lf"].T + params["b_lf"]
    return jax.nn.sigmoid(y)


# ----------------------------------------------------------------------------
# Self-test
# ----------------------------------------------------------------------------
if __name__ == "__main__":
    F_IN, HID = 32, 16            # in_features, hid_features (numlayer=2 default)
    ATOL = 2e-2                   # bf16 matmuls vs f32 reference (f32 accumulation)

    key = jax.random.PRNGKey(0)
    k_x1, k_x2, k_p, k_big = jax.random.split(key, 4)
    params = init_params(k_p, F_IN, HID)
    fused = prepare_fused_params(params, compute_dtype=jnp.bfloat16)

    # --- case 1: both inputs, single tile -----------------------------------
    N = 128
    x1 = jax.random.normal(k_x1, (N, F_IN), jnp.float32)
    x2 = jax.random.normal(k_x2, (N, F_IN), jnp.float32)
    out = jax.block_until_ready(node_weight_learner(x1, x2, fused))
    ref = _reference(x1, x2, params)
    assert out.shape == (N, 1)
    assert jnp.allclose(out, ref, atol=ATOL, rtol=ATOL), "mismatch (pair)"

    # --- case 2: x2 is None (specialized kernel, no zero-DMA) ---------------
    out_none = jax.block_until_ready(node_weight_learner(x1, None, fused))
    ref_none = _reference(x1, None, params)
    assert jnp.allclose(out_none, ref_none, atol=ATOL, rtol=ATOL), "mismatch (x2=None)"

    # --- case 3: multi-tile grid over N (exercises pipelined row tiling) ----
    N_BIG = 256
    kb1, kb2 = jax.random.split(k_big)
    xb1 = jax.random.normal(kb1, (N_BIG, F_IN), jnp.float32)
    xb2 = jax.random.normal(kb2, (N_BIG, F_IN), jnp.float32)
    out_big = jax.block_until_ready(
        node_weight_learner(xb1, xb2, fused, block_rows=128))   # grid=(2,)
    ref_big = _reference(xb1, xb2, params)
    assert jnp.allclose(out_big, ref_big, atol=ATOL, rtol=ATOL), "mismatch (tiled)"

    # --- case 4: N not a multiple of 8 (tile == full array) -----------------
    N_ODD = 200
    xo1 = xb1[:N_ODD]
    xo2 = xb2[:N_ODD]
    out_odd = jax.block_until_ready(node_weight_learner(xo1, xo2, fused))
    ref_odd = _reference(xo1, xo2, params)
    assert jnp.allclose(out_odd, ref_odd, atol=ATOL, rtol=ATOL), "mismatch (odd N)"

    # --- case 5: odd N with a partial last tile (padded rows discarded) -----
    out_odd_t = jax.block_until_ready(
        node_weight_learner(xo1, xo2, fused, block_rows=128))   # grid=(2,), pad=56
    assert out_odd_t.shape == (N_ODD, 1)
    assert jnp.allclose(out_odd_t, ref_odd, atol=ATOL, rtol=ATOL), "mismatch (padded)"

    print("KERNEL_OK")
</pallas_src>

<mosaic_0001>
module attributes {stable_mosaic.version = 11 : i64} {
  func.func @_nwl_kernel_pair(%arg0: i32, %arg1: memref<128x32xf32, #tpu.memory_space<vmem>>, %arg2: memref<128x32xf32, #tpu.memory_space<vmem>>, %arg3: memref<32x32xbf16, #tpu.memory_space<vmem>>, %arg4: memref<32x32xbf16, #tpu.memory_space<vmem>>, %arg5: memref<1x32xf32, #tpu.memory_space<vmem>>, %arg6: memref<1x32xf32, #tpu.memory_space<vmem>>, %arg7: memref<1x1xf32, #tpu.memory_space<vmem>>, %arg8: memref<1x128xf32, #tpu.memory_space<vmem>>) attributes {dimension_semantics = [#tpu.dimension_semantics<parallel>], iteration_bounds = array<i64: 1>, scalar_prefetch = 0 : i64, scratch_operands = 0 : i64, tpu.core_type = #tpu.core_type<tc>, window_params = [{transform_indices = @transform_0, window_bounds = array<i64: 128, 32>}, {transform_indices = @transform_1, window_bounds = array<i64: 128, 32>}, {pipeline_mode = #tpu.pipeline_mode<synchronous>, transform_indices = @transform_2, window_bounds = array<i64: 32, 32>}, {pipeline_mode = #tpu.pipeline_mode<synchronous>, transform_indices = @transform_3, window_bounds = array<i64: 32, 32>}, {pipeline_mode = #tpu.pipeline_mode<synchronous>, transform_indices = @transform_4, window_bounds = array<i64: 1, 32>}, {pipeline_mode = #tpu.pipeline_mode<synchronous>, transform_indices = @transform_5, window_bounds = array<i64: 1, 32>}, {pipeline_mode = #tpu.pipeline_mode<synchronous>, transform_indices = @transform_6, window_bounds = array<i64: 1, 1>}, {transform_indices = @transform_7, window_bounds = array<i64: 1, 128>}]} {
    %c0 = arith.constant 0 : index
    %c0_0 = arith.constant 0 : index
    %0 = vector.load %arg1[%c0, %c0_0] : memref<128x32xf32, #tpu.memory_space<vmem>>, vector<128x32xf32>
    %1 = arith.truncf %0 : vector<128x32xf32> to vector<128x32xbf16>
    %c0_1 = arith.constant 0 : index
    %c0_2 = arith.constant 0 : index
    %2 = vector.load %arg3[%c0_1, %c0_2] : memref<32x32xbf16, #tpu.memory_space<vmem>>, vector<32x32xbf16>
    %cst = arith.constant dense<0.000000e+00> : vector<128x32xf32>
    %3 = tpu.matmul %1, %2, %cst {dimension_numbers = #tpu.dot_dimension_numbers<[1], [0], [0], [1], [0, 0, 1, 1], [], []>} : vector<128x32xbf16>, vector<32x32xbf16>, vector<128x32xf32> -> vector<128x32xf32>
    %c0_3 = arith.constant 0 : index
    %c0_4 = arith.constant 0 : index
    %4 = vector.load %arg2[%c0_3, %c0_4] : memref<128x32xf32, #tpu.memory_space<vmem>>, vector<128x32xf32>
    %5 = arith.truncf %4 : vector<128x32xf32> to vector<128x32xbf16>
    %c0_5 = arith.constant 0 : index
    %c0_6 = arith.constant 0 : index
    %6 = vector.load %arg4[%c0_5, %c0_6] : memref<32x32xbf16, #tpu.memory_space<vmem>>, vector<32x32xbf16>
    %cst_7 = arith.constant dense<0.000000e+00> : vector<128x32xf32>
    %7 = tpu.matmul %5, %6, %cst_7 {dimension_numbers = #tpu.dot_dimension_numbers<[1], [0], [0], [1], [0, 0, 1, 1], [], []>} : vector<128x32xbf16>, vector<32x32xbf16>, vector<128x32xf32> -> vector<128x32xf32>
    %8 = arith.addf %3, %7 : vector<128x32xf32>
    %c0_8 = arith.constant 0 : index
    %c0_9 = arith.constant 0 : index
    %9 = vector.load %arg5[%c0_8, %c0_9] : memref<1x32xf32, #tpu.memory_space<vmem>>, vector<1x32xf32>
    %10 = vector.broadcast %9 : vector<1x32xf32> to vector<128x32xf32>
    %11 = arith.addf %8, %10 : vector<128x32xf32>
    %cst_10 = arith.constant 0.000000e+00 : f32
    %12 = vector.broadcast %cst_10 : f32 to vector<128x32xf32>
    %13 = arith.cmpf oge, %11, %12 : vector<128x32xf32>
    %cst_11 = arith.constant 2.000000e-01 : f32
    %14 = vector.broadcast %cst_11 : f32 to vector<128x32xf32>
    %15 = arith.mulf %14, %11 : vector<128x32xf32>
    %16 = arith.select %13, %11, %15 : vector<128x32xi1>, vector<128x32xf32>
    %c0_12 = arith.constant 0 : index
    %c0_13 = arith.constant 0 : index
    %17 = vector.load %arg6[%c0_12, %c0_13] : memref<1x32xf32, #tpu.memory_space<vmem>>, vector<1x32xf32>
    "tpu.trace_start"() <{level = 10 : i32, message = "oh,nh->on"}> : () -> ()
    %cst_14 = arith.constant dense<0.000000e+00> : vector<1x128xf32>
    %18 = tpu.matmul %17, %16, %cst_14 {dimension_numbers = #tpu.dot_dimension_numbers<[1], [1], [0], [0], [0, 0, 1, 0], [], []>} : vector<1x32xf32>, vector<128x32xf32>, vector<1x128xf32> -> vector<1x128xf32>
    "tpu.trace_stop"() : () -> ()
    %c0_15 = arith.constant 0 : index
    %c0_16 = arith.constant 0 : index
    %19 = vector.load %arg7[%c0_15, %c0_16] : memref<1x1xf32, #tpu.memory_space<vmem>>, vector<1x1xf32>
    %20 = vector.broadcast %19 : vector<1x1xf32> to vector<1x128xf32>
    %21 = arith.addf %18, %20 : vector<1x128xf32>
    %cst_17 = arith.constant 0.000000e+00 : f32
    %22 = vector.broadcast %cst_17 : f32 to vector<1x128xf32>
    %23 = arith.subf %22, %21 : vector<1x128xf32>
    %24 = math.exp %23 : vector<1x128xf32>
    %cst_18 = arith.constant 1.000000e+00 : f32
    %25 = vector.broadcast %cst_18 : f32 to vector<1x128xf32>
    %26 = arith.addf %25, %24 : vector<1x128xf32>
    %27 = tpu.reciprocal %26 {approx = true} : vector<1x128xf32> -> vector<1x128xf32>
    %c0_19 = arith.constant 0 : index
    %c0_20 = arith.constant 0 : index
    %28 = vector.load %arg8[%c0_19, %c0_20] : memref<1x128xf32, #tpu.memory_space<vmem>>, vector<1x128xf32>
    tpu.vector_store %arg8[%c0_19, %c0_20], %27 {strides = array<i32>} : memref<1x128xf32, #tpu.memory_space<vmem>>, vector<1x128xf32>,
    return
  }
  func.func @transform_0(%arg0: i32) -> (i32, i32) {
    %c0_i32 = arith.constant 0 : i32
    %c0_i32_0 = arith.constant 0 : i32
    return %arg0, %c0_i32 : i32, i32
  }
  func.func @transform_1(%arg0: i32) -> (i32, i32) {
    %c0_i32 = arith.constant 0 : i32
    %c0_i32_0 = arith.constant 0 : i32
    return %arg0, %c0_i32 : i32, i32
  }
  func.func @transform_2(%arg0: i32) -> (i32, i32) {
    %c0_i32 = arith.constant 0 : i32
    %c0_i32_0 = arith.constant 0 : i32
    %c0_i32_1 = arith.constant 0 : i32
    return %c0_i32, %c0_i32_0 : i32, i32
  }
  func.func @transform_3(%arg0: i32) -> (i32, i32) {
    %c0_i32 = arith.constant 0 : i32
    %c0_i32_0 = arith.constant 0 : i32
    %c0_i32_1 = arith.constant 0 : i32
    return %c0_i32, %c0_i32_0 : i32, i32
  }
  func.func @transform_4(%arg0: i32) -> (i32, i32) {
    %c0_i32 = arith.constant 0 : i32
    %c0_i32_0 = arith.constant 0 : i32
    %c0_i32_1 = arith.constant 0 : i32
    return %c0_i32, %c0_i32_0 : i32, i32
  }
  func.func @transform_5(%arg0: i32) -> (i32, i32) {
    %c0_i32 = arith.constant 0 : i32
    %c0_i32_0 = arith.constant 0 : i32
    %c0_i32_1 = arith.constant 0 : i32
    return %c0_i32, %c0_i32_0 : i32, i32
  }
  func.func @transform_6(%arg0: i32) -> (i32, i32) {
    %c0_i32 = arith.constant 0 : i32
    %c0_i32_0 = arith.constant 0 : i32
    %c0_i32_1 = arith.constant 0 : i32
    return %c0_i32, %c0_i32_0 : i32, i32
  }
  func.func @transform_7(%arg0: i32) -> (i32, i32) {
    %c0_i32 = arith.constant 0 : i32
    %c0_i32_0 = arith.constant 0 : i32
    return %c0_i32, %arg0 : i32, i32
  }
}

</mosaic_0001>

<bundles_post_ra>
// kernel: tpu_custom_call.1
= control target key start
LH: loop header
LB: loop body
LE: loop exit
PB: predicated region body
PF: predicated region fallthrough
CT: control target
= control target key end

     0   :  { %s1026_s0 = inlined_call_operand.vmem [shape: f32[128,32], index: 0, kind: input, shape index: {}]   ;;  %s1027_s1 = inlined_call_operand.vmem [shape: f32[128,32], index: 1, kind: input, shape index: {}]   ;;  %s1028_s2 = inlined_call_operand.vmem [shape: bf16[32,32], index: 2, kind: input, shape index: {}]   ;;  %s1029_s3 = inlined_call_operand.vmem [shape: bf16[32,32], index: 3, kind: input, shape index: {}]   ;;  %s1030_s4 = inlined_call_operand.vmem [shape: f32[1,32], index: 4, kind: input, shape index: {}]   ;;  %s1031_s5 = inlined_call_operand.vmem [shape: f32[1,32], index: 5, kind: input, shape index: {}]   ;;  %s1032_s6 = inlined_call_operand.<no memory space> [shape: f32[1,1], index: 6, kind: input, shape index: {}]   ;;  %s1033_s7 = inlined_call_operand.hbm [shape: f32[1,128], index: 7, kind: output, shape index: {}]  }
   0x1   :  { %v12_v0 = vstv %s1032_s6 }
   0x2   :  { %13 = vst [vmem:[#allocation2] sm:$0x1] %v12_v0 }
   0x3   :  { %v731_v1 = vld [vmem:[%s1029_s3 + $0x8] sm:$0xff]   ;;  %v732_v2 = vld [vmem:[%s1029_s3] sm:$0xff]   ;;  %vm98_vm0 = vcmask 261120   ;;  %v60_v5 = vld [vmem:[%s1027_s1 + $0x10] sm:$0xff] }
   0x4   :  { %651 = vmatprep.subr.bf16.mxu1 %v731_v1  ;;  %v58_v3 = vld [vmem:[%s1027_s1] sm:$0xff]  ;;  %v59_v4 = vld [vmem:[%s1027_s1 + $0x8] sm:$0xff]  ;;  %v61_v7 = vld [vmem:[%s1027_s1 + $0x18] sm:$0xff] }
   0x5   :  { %652 = vmatpush3.bf16.msra.mxu1 %v731_v1  ;;  %v74_v6 = vpack.c.bf16 %v59_v4, %v58_v3  ;;  %v733_v8 = vld [vmem:[%s1028_s2 + $0x8] sm:$0xff]   ;;  %v62_v9 = vld [vmem:[%s1027_s1 + $0x20] sm:$0xff]  ;;  %v75_v11 = vpack.c.bf16 %v61_v7, %v60_v5  ;;  %v64_v14 = vld [vmem:[%s1027_s1 + $0x30] sm:$0xff] }
   0x6   :  { %653 = vmatprep.subr.bf16.mxu1 %v732_v2  ;;  %v63_v10 = vld [vmem:[%s1027_s1 + $0x28] sm:$0xff]  ;;  %v734_v13 = vld [vmem:[%s1028_s2] sm:$0xff]   ;;  %v65_v15 = vld [vmem:[%s1027_s1 + $0x38] sm:$0xff] }
   0x7   :  { %655 = vmatprep.mubr.msk.bf16.mxu1 %vm98_vm0, %v74_v6  ;;  %v76_v12 = vpack.c.bf16 %v63_v10, %v62_v9  ;;  %v66_v16 = vld [vmem:[%s1027_s1 + $0x40] sm:$0xff]  ;;  %v67_v17 = vld [vmem:[%s1027_s1 + $0x48] sm:$0xff]  ;;  %v77_v18 = vpack.c.bf16 %v65_v15, %v64_v14 }
   0x9   :  { %654 = vmatpush3.bf16.msra.mxu1 %v732_v2 }
   0xa   :  { %671 = vmatprep.subr.bf16.mxu1 %v733_v8 }
   0xc   :  { %656 = vmatmul.mubr.msk.bf16.vlgmr.msra.gmra.mxu1 %vm98_vm0, %v75_v11 }
   0xd   :  { %672 = vmatpush3.bf16.msra.mxu1 %v733_v8  ;;  %659 = vmatprep.mubr.msk.bf16.mxu1 %vm98_vm0, %v76_v12 }
   0xe   :  { %673 = vmatprep.subr.bf16.mxu1 %v734_v13 }
   0xf   :  { %14 = vsyncpa [#allocation4], 0  ;;  %v78_v19 = vpack.c.bf16 %v67_v17, %v66_v16  ;;  %v68_v20 = vld [vmem:[%s1027_s1 + $0x50] sm:$0xff]  ;;  %v69_v21 = vld [vmem:[%s1027_s1 + $0x58] sm:$0xff]  ;;  %v761_v53 = vmov 0.0   ;;  %vm762_vm1 = vmmov 0  }
  0x10   :  { %v70_v22 = vld [vmem:[%s1027_s1 + $0x60] sm:$0xff]  ;;  %v71_v23 = vld [vmem:[%s1027_s1 + $0x68] sm:$0xff]  ;;  %v79_v24 = vpack.c.bf16 %v69_v21, %v68_v20  ;;  %v72_v26 = vld [vmem:[%s1027_s1 + $0x70] sm:$0xff]  ;;  %691 = vmatprep.subr.mxu0 %v761_v53  ;;  %723 = vmatprep.mubr.msk.f32.mxu0 %vm762_vm1, %v761_v53  ;;  %v763_v58 = vmov 0  }
  0x11   :  { %674 = vmatpush3.bf16.msra.mxu1 %v734_v13  ;;  %v80_v25 = vpack.c.bf16 %v71_v23, %v70_v22  ;;  %v73_v27 = vld [vmem:[%s1027_s1 + $0x78] sm:$0xff]  ;;  %v30_v28 = vld [vmem:[%s1026_s0] sm:$0xff]  ;;  %v31_v29 = vld [vmem:[%s1026_s0 + $0x8] sm:$0xff]  ;;  %730 = vset.pattern.permute.xlu0 %v763_v58  ;;  %s764_s1 = smov [#allocation3]  }
  0x12   :  { %v81_v30 = vpack.c.bf16 %v73_v27, %v72_v26  ;;  %v46_v31 = vpack.c.bf16 %v31_v29, %v30_v28  ;;  %v32_v32 = vld [vmem:[%s1026_s0 + $0x10] sm:$0xff]  ;;  %v33_v33 = vld [vmem:[%s1026_s0 + $0x18] sm:$0xff]  ;;  %v34_v34 = vld [vmem:[%s1026_s0 + $0x20] sm:$0xff]  ;;  %s568_s22 = sshll.u32 %s764_s1, 4  ;;  %s569_s22 = int_to_ptr.vmem [resolvable:$true] %s568_s22 }
  0x13   :  { %v35_v35 = vld [vmem:[%s1026_s0 + $0x28] sm:$0xff]  ;;  %v47_v36 = vpack.c.bf16 %v33_v33, %v32_v32  ;;  %v36_v38 = vld [vmem:[%s1026_s0 + $0x30] sm:$0xff]  ;;  %v37_v39 = vld [vmem:[%s1026_s0 + $0x38] sm:$0xff]  ;;  %s743_s23 = scalar_lea.vmem %s569_s22, 32  ;;  %p744_p1 = scmp.lt.s32.totalorder %s569_s22, %s569_s22 }
  0x14   :  { %660 = vmatmul.mubr.msk.bf16.gmra.mxu1 %vm98_vm0, %v77_v18  ;;  %v48_v37 = vpack.c.bf16 %v35_v35, %v34_v34  ;;  %v38_v40 = vld [vmem:[%s1026_s0 + $0x40] sm:$0xff]  ;;  %v39_v41 = vld [vmem:[%s1026_s0 + $0x48] sm:$0xff]  ;;  %v49_v42 = vpack.c.bf16 %v37_v39, %v36_v38  ;;  %v40_v44 = vld [vmem:[%s1026_s0 + $0x50] sm:$0xff] }
  0x15   :  { %663 = vmatprep.mubr.msk.bf16.mxu1 %vm98_vm0, %v78_v19  ;;  %v50_v43 = vpack.c.bf16 %v39_v41, %v38_v40  ;;  %v41_v45 = vld [vmem:[%s1026_s0 + $0x58] sm:$0xff]  ;;  %v42_v46 = vld [vmem:[%s1026_s0 + $0x60] sm:$0xff]  ;;  %v43_v47 = vld [vmem:[%s1026_s0 + $0x68] sm:$0xff] }
  0x16   :  { %v51_v48 = vpack.c.bf16 %v41_v45, %v40_v44  ;;  %v52_v49 = vpack.c.bf16 %v43_v47, %v42_v46  ;;  %v44_v50 = vld [vmem:[%s1026_s0 + $0x70] sm:$0xff]  ;;  %v45_v51 = vld [vmem:[%s1026_s0 + $0x78] sm:$0xff]  ;;  %v425_v56 = vld [vmem:[#allocation2] sm:$0x1] }
  0x17   :  { %v53_v52 = vpack.c.bf16 %v45_v51, %v44_v50  ;;  %428 = vperm.xlu0 %730, %v425_v56   ;;  %v959_v29 = vld [vmem:[%s1030_s4] ss:$0 sm:$0xff] }
  0x1c   :  { %664 = vmatmul.mubr.msk.bf16.gmra.mxu1 %vm98_vm0, %v79_v24 }
  0x1d   :  { %667 = vmatprep.mubr.msk.bf16.mxu1 %vm98_vm0, %v80_v25 }
  0x24   :  { %668 = vmatmul.mubr.msk.bf16.gmra.mxu1 %vm98_vm0, %v81_v30 }
  0x25   :  { %675 = vmatprep.mubr.msk.bf16.mxu1 %vm98_vm0, %v46_v31 }
  0x2c   :  { %676 = vmatmul.mubr.msk.bf16.vlgmr.msra.gmra.mxu1 %vm98_vm0, %v47_v36 }
  0x2d   :  { %679 = vmatprep.mubr.msk.bf16.mxu1 %vm98_vm0, %v48_v37 }
  0x34   :  { %680 = vmatmul.mubr.msk.bf16.gmra.mxu1 %vm98_vm0, %v49_v42 }
  0x35   :  { %683 = vmatprep.mubr.msk.bf16.mxu1 %vm98_vm0, %v50_v43 }
  0x3c   :  { %684 = vmatmul.mubr.msk.bf16.gmra.mxu1 %vm98_vm0, %v51_v48 }
  0x3d   :  { %687 = vmatprep.mubr.msk.bf16.mxu1 %vm98_vm0, %v52_v49 }
  0x44   :  { %688 = vmatmul.mubr.msk.bf16.gmra.mxu1 %vm98_vm0, %v53_v52 }
  0xcc   :  { %v657_v54 = vpop.f32.mrf.mxu1 }
  0xce   :  { %v157_v55 = vpop.f32.mrf.mxu1 }
  0xd0   :  { %v658_v57 = vpop.f32.mrf.mxu1 }
  0xd2   :  { %v160_v59 = vpop.f32.mrf.mxu1 }
  0xd4   :  { %v934_v60 = vpop.f32.mrf.mxu1 }
  0xd6   :  { %v936_v61 = vpop.f32.mrf.mxu1 }
  0xd8   :  { %v938_v62 = vpop.f32.mrf.mxu1 }
  0xda   :  { %v940_v63 = vpop.f32.mrf.mxu1 }
  0xdc   :  { %v665_v0 = vpop.f32.mrf.mxu1 }
  0xde   :  { %v942_v1 = vpop.f32.mrf.mxu1 }
  0xe0   :  { %v666_v2 = vpop.f32.mrf.mxu1 }
  0xe2   :  { %v192_v3 = vpop.f32.mrf.mxu1 }
  0xe4   :  { %v669_v4 = vpop.f32.mrf.mxu1 }
  0xe6   :  { %v205_v5 = vpop.f32.mrf.mxu1 }
  0xe8   :  { %v670_v6 = vpop.f32.mrf.mxu1 }
  0xea   :  { %v208_v7 = vpop.f32.mrf.mxu1 }
  0xec   :  { %v677_v8 = vpop.f32.mrf.mxu1 }
  0xed   :  { %v944_v9 = vadd.f32 %v677_v8, %v657_v54 }
  0xee   :  { %v290_v10 = vpop.f32.mrf.mxu1 }
  0xef   :  { %v946_v11 = vadd.f32 %v290_v10, %v157_v55 }
  0xf0   :  { %v678_v12 = vpop.f32.mrf.mxu1 }
  0xf1   :  { %v948_v13 = vadd.f32 %v678_v12, %v658_v57 }
  0xf2   :  { %v293_v14 = vpop.f32.mrf.mxu1 }
  0xf3   :  { %v950_v15 = vadd.f32 %v293_v14, %v160_v59 }
  0xf4   :  { %v681_v16 = vpop.f32.mrf.mxu1 }
  0xf6   :  { %v952_v17 = vpop.f32.mrf.mxu1 }
  0xf8   :  { %v682_v18 = vpop.f32.mrf.mxu1 }
  0xf9   :  { %v318_v56 = vadd.f32 %v682_v18, %v938_v62  ;;  %v362_v18 = vadd.f32 %v959_v29, %v944_v9  ;;  %v360_v9 = vadd.f32 %v959_v29, %v946_v11  ;;  %v424_v11 = vld [vmem:[%s1031_s5] sm:$0x1]  ;;  %s739_s5 = scalar_lea.vmem %s569_s22, 16 }
  0xfa   :  { %v954_v19 = vpop.f32.mrf.mxu1  ;;  %p740_p0 = scmp.ne.s32.totalorder %s569_s22, %s739_s5  ;;  %p745_p2 = scmp.lt.s32.totalorder %s743_s23, %s739_s5 }
  0xfb   :  { %vm378_vm15 = vcmp.ge.f32.partialorder %v362_v18, 0.0 }
  0xfc   :  { %v685_v20 = vpop.f32.mrf.mxu1  ;;  %p746_p3 = por %p745_p2, %p744_p1 }
  0xfd   :  { %v331_v43 = vadd.f32 %v685_v20, %v665_v0  ;;  %v315_v0 = vadd.f32 %v681_v16, %v934_v60 }
  0xfe   :  { %v322_v21 = vpop.f32.mrf.mxu1  ;;  %p747_p4 = pnand %p746_p3, %p740_p0 }
  0xff   :  { %v370_v47 = vadd.f32 %v959_v29, %v331_v43  ;;  %v323_v52 = vadd.f32 %v322_v21, %v942_v1  ;;  %v367_v1 = vadd.f32 %v959_v29, %v318_v56  ;;  %v366_v62 = vadd.f32 %v959_v29, %v315_v0 }
 0x100   :  { %v686_v22 = vpop.f32.mrf.mxu1  ;;  %v394_v21 = vmul.f32 0.2, %v362_v18 }
 0x101   :  { %v334_v39 = vadd.f32 %v686_v22, %v666_v2  ;;  %v402_v51 = vmul.f32 0.2, %v370_v47  ;;  %vm386_vm7 = vcmp.ge.f32.partialorder %v370_v47, 0.0  ;;  %v368_v57 = vadd.f32 %v959_v29, %v323_v52 }
 0x102   :  { %v325_v23 = vpop.f32.mrf.mxu1  ;;  %vm383_vm10 = vcmp.ge.f32.partialorder %v367_v1, 0.0  ;;  %v398_v60 = vmul.f32 0.2, %v366_v62  ;;  %vm382_vm11 = vcmp.ge.f32.partialorder %v366_v62, 0.0 }
 0x103   :  { %v371_v44 = vadd.f32 %v959_v29, %v334_v39  ;;  %v326_v49 = vadd.f32 %v325_v23, %v192_v3  ;;  %v418_v59 = vsel %vm386_vm7, %v370_v47, %v402_v51  ;;  %v400_v2 = vmul.f32 0.2, %v368_v57 }
 0x104   :  { %v689_v24 = vpop.f32.mrf.mxu1  ;;  %vm384_vm9 = vcmp.ge.f32.partialorder %v368_v57, 0.0  ;;  %v414_v14 = vsel %vm382_vm11, %v366_v62, %v398_v60 }
 0x105   :  { %v347_v26 = vadd.f32 %v689_v24, %v669_v4  ;;  %v403_v48 = vmul.f32 0.2, %v371_v44  ;;  %vm387_vm6 = vcmp.ge.f32.partialorder %v371_v44, 0.0  ;;  %v369_v54 = vadd.f32 %v959_v29, %v326_v49 }
 0x106   :  { %v338_v25 = vpop.f32.mrf.mxu1  ;;  %v399_v4 = vmul.f32 0.2, %v367_v1  ;;  %v410_v24 = vsel %vm378_vm15, %v362_v18, %v394_v21 }
 0x107   :  { %v374_v31 = vadd.f32 %v959_v29, %v347_v26  ;;  %v339_v36 = vadd.f32 %v338_v25, %v205_v5  ;;  %v419_v55 = vsel %vm387_vm6, %v371_v44, %v403_v48  ;;  %v401_v58 = vmul.f32 0.2, %v369_v54 }
 0x108   :  { %v690_v27 = vpop.f32.mrf.mxu1  ;;  %vm385_vm8 = vcmp.ge.f32.partialorder %v369_v54, 0.0  ;;  %v310_v5 = vadd.f32 %v954_v19, %v940_v63  ;;  %v415_v10 = vsel %vm383_vm10, %v367_v1, %v399_v4  ;;  %v392_v25 = vmul.f32 0.2, %v360_v9 }
 0x109   :  { %v350_v28 = vadd.f32 %v690_v27, %v670_v6  ;;  %v406_v35 = vmul.f32 0.2, %v374_v31  ;;  %vm390_vm3 = vcmp.ge.f32.partialorder %v374_v31, 0.0  ;;  %v372_v40 = vadd.f32 %v959_v29, %v339_v36 }
 0x10a   :  { %v341_v30 = vpop.f32.mrf.mxu1  ;;  %v417_v3 = vsel %vm385_vm8, %v369_v54, %v401_v58  ;;  %v416_v6 = vsel %vm384_vm9, %v368_v57, %v400_v2  ;;  %v365_v8 = vadd.f32 %v959_v29, %v310_v5  ;;  %v431_v27 = vlaneseq }
 0x10b   :  { %v375_v32 = vadd.f32 %v959_v29, %v350_v28  ;;  %v342_v33 = vadd.f32 %v341_v30, %v208_v7  ;;  %v422_v42 = vsel %vm390_vm3, %v374_v31, %v406_v35  ;;  %v404_v45 = vmul.f32 0.2, %v372_v40  ;;  %v429_v30 = vpop.permute.xlu0 %428 }
 0x10c   :  { %vm388_vm5 = vcmp.ge.f32.partialorder %v372_v40, 0.0  ;;  %v307_v7 = vadd.f32 %v952_v17, %v936_v61  ;;  %v397_v12 = vmul.f32 0.2, %v365_v8  ;;  %vm381_vm12 = vcmp.ge.f32.partialorder %v365_v8, 0.0 }
 0x10d   :  { %vm391_vm2 = vcmp.ge.f32.partialorder %v375_v32, 0.0  ;;  %v407_v34 = vmul.f32 0.2, %v375_v32  ;;  %v373_v37 = vadd.f32 %v959_v29, %v342_v33  ;;  %v420_v50 = vsel %vm388_vm5, %v372_v40, %v404_v45 }
 0x10e   :  { %v364_v63 = vadd.f32 %v959_v29, %v307_v7  ;;  %v363_v61 = vadd.f32 %v959_v29, %v948_v13  ;;  %v413_v17 = vsel %vm381_vm12, %v365_v8, %v397_v12  ;;  %v361_v13 = vadd.f32 %v959_v29, %v950_v15 }
 0x10f   :  { %v423_v38 = vsel %vm391_vm2, %v375_v32, %v407_v34  ;;  %v405_v41 = vmul.f32 0.2, %v373_v37  ;;  %vm389_vm4 = vcmp.ge.f32.partialorder %v373_v37, 0.0  ;;  %vm376_vm2 = vcmp.ge.f32.partialorder %v360_v9, 0.0 }
 0x110   :  { %692 = vmatpush3.xpose.msk.msra.mxu0 %vm98_vm0, %v423_v38  ;;  %v396_v16 = vmul.f32 0.2, %v364_v63  ;;  %vm380_vm13 = vcmp.ge.f32.partialorder %v364_v63, 0.0  ;;  %v395_v19 = vmul.f32 0.2, %v363_v61  ;;  %vm379_vm14 = vcmp.ge.f32.partialorder %v363_v61, 0.0 }
 0x111   :  { %693 = vmatprep.subr.mxu0 %v761_v53  ;;  %v421_v46 = vsel %vm389_vm4, %v373_v37, %v405_v41  ;;  %v393_v23 = vmul.f32 0.2, %v361_v13  ;;  %vm377_vm1 = vcmp.ge.f32.partialorder %v361_v13, 0.0  ;;  %v408_v15 = vsel %vm376_vm2, %v360_v9, %v392_v25 }
 0x112   :  { %v412_v20 = vsel %vm380_vm13, %v364_v63, %v396_v16  ;;  %v411_v22 = vsel %vm379_vm14, %v363_v61, %v395_v19  ;;  %v432_v28 = vshrl.u32 %v431_v27, 7 }
 0x113   :  { %v409_v26 = vsel %vm377_vm1, %v361_v13, %v393_v23 }
 0x114   :  { %694 = vmatpush3.xpose.msk.msra.mxu0 %vm98_vm0, %v422_v42  ;;  %v433_v29 = vsub.s32 0, %v432_v28 }
 0x115   :  { %695 = vmatprep.subr.mxu0 %v761_v53 }
 0x116   :  { %v434_v31 = vrot.slane %v429_v30, %v433_v29 }
 0x118   :  { %696 = vmatpush3.xpose.msk.msra.mxu0 %vm98_vm0, %v421_v46 }
 0x119   :  { %697 = vmatprep.subr.mxu0 %v761_v53 }
 0x11c   :  { %698 = vmatpush3.xpose.msk.msra.mxu0 %vm98_vm0, %v420_v50 }
 0x11d   :  { %699 = vmatprep.subr.mxu0 %v761_v53 }
 0x120   :  { %700 = vmatpush3.xpose.msk.msra.mxu0 %vm98_vm0, %v419_v55 }
 0x121   :  { %701 = vmatprep.subr.mxu0 %v761_v53 }
 0x124   :  { %702 = vmatpush3.xpose.msk.msra.mxu0 %vm98_vm0, %v418_v59 }
 0x125   :  { %703 = vmatprep.subr.mxu0 %v761_v53 }
 0x128   :  { %704 = vmatpush3.xpose.msk.msra.mxu0 %vm98_vm0, %v417_v3 }
 0x129   :  { %705 = vmatprep.subr.mxu0 %v761_v53 }
 0x12c   :  { %706 = vmatpush3.xpose.msk.msra.mxu0 %vm98_vm0, %v416_v6 }
 0x12d   :  { %707 = vmatprep.subr.mxu0 %v761_v53 }
 0x130   :  { %708 = vmatpush3.xpose.msk.msra.mxu0 %vm98_vm0, %v415_v10 }
 0x131   :  { %709 = vmatprep.subr.mxu0 %v761_v53 }
 0x134   :  { %710 = vmatpush3.xpose.msk.msra.mxu0 %vm98_vm0, %v414_v14 }
 0x135   :  { %711 = vmatprep.subr.mxu0 %v761_v53 }
 0x138   :  { %712 = vmatpush3.xpose.msk.msra.mxu0 %vm98_vm0, %v413_v17 }
 0x139   :  { %713 = vmatprep.subr.mxu0 %v761_v53 }
 0x13c   :  { %714 = vmatpush3.xpose.msk.msra.mxu0 %vm98_vm0, %v412_v20 }
 0x13d   :  { %715 = vmatprep.subr.mxu0 %v761_v53 }
 0x140   :  { %716 = vmatpush3.xpose.msk.msra.mxu0 %vm98_vm0, %v411_v22 }
 0x141   :  { %717 = vmatprep.subr.mxu0 %v761_v53 }
 0x144   :  { %718 = vmatpush3.xpose.msk.msra.mxu0 %vm98_vm0, %v410_v24 }
 0x145   :  { %719 = vmatprep.subr.mxu0 %v761_v53 }
 0x148   :  { %720 = vmatpush3.xpose.msk.msra.mxu0 %vm98_vm0, %v409_v26 }
 0x149   :  { %721 = vmatprep.subr.mxu0 %v761_v53 }
 0x14c   :  { %722 = vmatpush3.xpose.msk.msra.mxu0 %vm98_vm0, %v408_v15 }
 0x14f   :  { %724 = vmatmul.mubr.msk.f32.vlgmr.msra.gmra.mxu0 %vm98_vm0, %v424_v11 }
 0x20f   :  { %v552_v32 = vpop.f32.mrf.mxu0 }
 0x210   :  { %v553_v33 = vadd.f32 %v552_v32, %v434_v31 }
 0x211   :  { %v725_v34 = vpop.f32.mrf.mxu0 }
 0x212   :  { %v556_v35 = vsub.f32 0.0, %v553_v33 }
 0x214   :  { %v557_v36 = vmul.f32 1.442695, %v556_v35 }
 0x216   :  { %735 = vpow2.f32 %v557_v36 }
 0x223   :  { %v736_v53 = vpop.eup %735 }
 0x224   :  { %v559_v37 = vadd.f32 1.0, %v736_v53 }
 0x226   :  { %737 = vrcp.f32 %v559_v37 }
 0x233   :  { %v738_v38 = vpop.eup %737 }
 0x234   :  { %561 = vst [vmem:[#allocation3] sm:$0x1] %v738_v38 }
 0x235   :  { %750 = shalt.err (!%p747_p4)
}
 0x236   :  { %571 = dma.vmem_to_hbm [thread:$0]  %s569_s22, 16, %s1033_s7, [#allocation4]  }
 0x237   :  { %759 = dma.done.wait [#allocation4], 16  }
 0x238   :  { %760 = vsyncadd [#allocation4], 4294967280 }
 0x239   :  { %575 = vsyncpa [#allocation4], 1 }

</bundles_post_ra>
